<compile_context>
chip_gen: v6e
topology: v6e:2x2x1
jax: 0.10.0
libtpu: 0.0.40
codegen_flags: <defaults>
</compile_context>

<pallas_src>
import functools

import jax
import jax.numpy as jnp
from jax.experimental import pallas as pl
from jax.experimental.pallas import tpu as pltpu

LANES = 128  # lane width used for all packed parameter pieces / the output


def _round8(x):
    return (x + 7) // 8 * 8


# ------------------------- fused forward kernel -----------------------------
def make_rmtpp_kernel(*, B, T, V, H, M, VP, OFF):
    """Builds the fused kernel with all shape/offset constants baked in.

    Kernel refs:
      data_ref : (T*B, 2) f32   col 0 = event id (as float), col 1 = time,
                                time-major rows (row = t*B + b)
      p_ref    : (rows, 128) f32 packed parameter slab (see prepare_params)
      out_ref  : (B, 128) f32    cols [0:C) event logits, col C time logit
    """
    TB = T * B
    G = 4 * H

    def kernel(data_ref, p_ref, out_ref):
        data = data_ref[...]                                   # (TB, 2)
        ev = data[:, 0:1].astype(jnp.int32)                    # (TB, 1)
        tm = data[:, 1:2]                                      # (TB, 1)

        # Augmented one-hot: cols [0,V) one-hot(event), col V = time value,
        # col V+1 = constant 1 (picks up the fused LSTM bias row), rest zero.
        col = jax.lax.broadcasted_iota(jnp.int32, (TB, VP), 1)
        aug = (col == ev).astype(jnp.float32)
        aug = jnp.where(col == V, tm, aug)
        aug = jnp.where(col == V + 1, jnp.float32(1.0), aug)   # (TB, VP)

        # Single MXU op: gather + input projection + bias, hoisted out of the
        # recurrence.  Lives in vregs (TB x 128 f32 = 8 vregs at demo shapes).
        proj = p_ref[OFF["proj"]:OFF["proj"] + VP, :]          # (VP, 128)
        xproj = jnp.dot(aug, proj, preferred_element_type=jnp.float32)

        whh = p_ref[OFF["whh"]:OFF["whh"] + H, :]              # (H, 128)

        # ---- LSTM recurrence: strictly serial, fully unrolled, one matmul
        # per step; gates stay in vregs, no VMEM round-trips. ---------------
        h = jnp.zeros((B, H), jnp.float32)
        c = jnp.zeros((B, H), jnp.float32)
        for t in range(T):                                     # static unroll
            gates = (xproj[t * B:(t + 1) * B, :]
                     + jnp.dot(h, whh, preferred_element_type=jnp.float32))
            # 2 full-width EUP pushes instead of 5 narrow ones; i/f/g/o are
            # cheap lane slices.  PyTorch LSTM gate order: i, f, g, o.
            sg = jax.nn.sigmoid(gates)
            th = jnp.tanh(gates)
            i = sg[:, 0 * H:1 * H]
            f = sg[:, 1 * H:2 * H]
            g = th[:, 2 * H:3 * H]
            o = sg[:, 3 * H:4 * H]
            c = f * c + i * g
            h = o * jnp.tanh(c)

        # ---- MLP + fused (event | time) heads, single lane-dense store ----
        wm = p_ref[OFF["wmlp"]:OFF["wmlp"] + H, :]             # (H, 128)
        bm = p_ref[OFF["bmlp"]:OFF["bmlp"] + 1, :]             # (1, 128)
        mlp = jnp.tanh(jnp.dot(h, wm, preferred_element_type=jnp.float32) + bm)
        # mlp dropout is identity at inference.

        wh = p_ref[OFF["whead"]:OFF["whead"] + LANES, :]       # (128, 128)
        bh = p_ref[OFF["bhead"]:OFF["bhead"] + 1, :]           # (1, 128)
        out_ref[...] = (jnp.dot(mlp, wh, preferred_element_type=jnp.float32)
                        + bh)

    return kernel


# --------------------- one-time parameter packing ----------------------------
def prepare_params(params):
    """Packs all weights into a single (rows, 128) f32 slab.  Runs ONCE at
    setup; the per-call jitted path never re-does concat/pad/matmul prep."""
    emb = params["embedding"]                  # (V, E)
    w_ih = params["w_ih"]                      # (E+1, 4H) (in, out) layout
    w_hh = params["w_hh"]                      # (H, 4H)
    b_lstm = params["b_lstm"]                  # (1, 4H) = b_ih + b_hh
    w_mlp, b_mlp = params["w_mlp"], params["b_mlp"]   # (H, M), (1, M)
    w_ev, b_ev = params["w_ev"], params["b_ev"]       # (M, C), (1, C)
    w_tm, b_tm = params["w_tm"], params["b_tm"]       # (M, 1), (1, 1)

    V, E = emb.shape
    H, G = w_hh.shape
    M = w_mlp.shape[1]
    C = w_ev.shape[1]
    assert G == 4 * H and G <= LANES and M <= LANES and C + 1 <= LANES

    VP = _round8(V + 2)        # V projected-embedding rows + time row + bias row
    f32 = jnp.float32

    # Augmented projection table (embedding gather + time + bias fused).
    proj = jnp.zeros((VP, LANES), f32)
    proj = proj.at[:V, :G].set((emb @ w_ih[:E, :]).astype(f32))
    proj = proj.at[V, :G].set(w_ih[E, :])
    proj = proj.at[V + 1, :G].set(b_lstm[0])

    whh_p = jnp.zeros((_round8(H), LANES), f32).at[:H, :G].set(w_hh)
    wmlp_p = jnp.zeros((_round8(H), LANES), f32).at[:H, :M].set(w_mlp)
    bmlp_p = jnp.zeros((8, LANES), f32).at[0, :M].set(b_mlp[0])
    # Fused (event | time) head, padded to a full (128, 128) block so the head
    # matmul is a single full-width MXU op with a lane-dense output.
    whead_p = (jnp.zeros((LANES, LANES), f32)
               .at[:M, :C].set(w_ev)
               .at[:M, C].set(w_tm[:, 0]))
    bhead_p = (jnp.zeros((8, LANES), f32)
               .at[0, :C].set(b_ev[0])
               .at[0, C].set(b_tm[0, 0]))

    pieces = [("proj", proj), ("whh", whh_p), ("wmlp", wmlp_p),
              ("bmlp", bmlp_p), ("whead", whead_p), ("bhead", bhead_p)]
    OFF, row = {}, 0
    for name, arr in pieces:
        OFF[name] = row
        row += arr.shape[0]
    slab = jnp.concatenate([arr for _, arr in pieces], axis=0)   # (rows, 128)

    meta = dict(V=V, E=E, H=H, M=M, C=C, VP=VP, OFF=OFF)
    return slab, meta


# ------------------------------ full forward --------------------------------
def make_net_forward(meta):
    V, H, M, C, VP, OFF = (meta["V"], meta["H"], meta["M"], meta["C"],
                           meta["VP"], meta["OFF"])

    def net_forward(slab, input_time, input_events):
        B, T = input_events.shape
        # Tiny layout glue: time-major flatten, event id + time packed into one
        # (T*B, 2) f32 slab -> a single input DMA.
        data = jnp.stack([input_events.T.astype(jnp.float32),
                          input_time.T.astype(jnp.float32)],
                         axis=-1).reshape(T * B, 2)

        kernel = make_rmtpp_kernel(B=B, T=T, V=V, H=H, M=M, VP=VP, OFF=OFF)
        vmem = pl.BlockSpec(memory_space=pltpu.MemorySpace.VMEM)
        out = pl.pallas_call(
            kernel,
            out_shape=jax.ShapeDtypeStruct((B, LANES), jnp.float32),
            in_specs=[vmem, vmem],
            out_specs=vmem,
        )(data, slab)

        event_logits = out[:, :C]
        time_logits = out[:, C:C + 1]
        return time_logits, event_logits

    return net_forward


# --------------------------- pure-JAX reference ------------------------------
def net_forward_ref(params, input_time, input_events):
    emb = params["embedding"][input_events]
    x = jnp.concatenate([emb, input_time[..., None]], axis=-1)   # (B, T, Din)
    B, T, _ = x.shape
    H = params["w_hh"].shape[0]

    def step(carry, xt):
        h, c = carry
        gates = xt @ params["w_ih"] + h @ params["w_hh"] + params["b_lstm"][0]
        i = jax.nn.sigmoid(gates[:, 0 * H:1 * H])
        f = jax.nn.sigmoid(gates[:, 1 * H:2 * H])
        g = jnp.tanh(gates[:, 2 * H:3 * H])
        o = jax.nn.sigmoid(gates[:, 3 * H:4 * H])
        c = f * c + i * g
        h = o * jnp.tanh(c)
        return (h, c), None

    (h, _), _ = jax.lax.scan(step,
                             (jnp.zeros((B, H)), jnp.zeros((B, H))),
                             jnp.transpose(x, (1, 0, 2)))
    mlp = jnp.tanh(h @ params["w_mlp"] + params["b_mlp"][0])
    ev = mlp @ params["w_ev"] + params["b_ev"][0]
    tm = mlp @ params["w_tm"] + params["b_tm"][0]
    return tm, ev


# ---------------------------------- main -------------------------------------
if __name__ == "__main__":
    # config consistent with the module: emb_dim + 1 = LSTM input size, 4H = 128
    EVENT_CLASS = 8
    EMB_DIM = 15
    HID_DIM = 32
    MLP_DIM = 32
    B, T = 8, 8            # B = 8 fills all sublanes of a vreg

    key = jax.random.PRNGKey(0)
    ks = jax.random.split(key, 12)
    s = 0.1
    params = {
        "embedding": s * jax.random.normal(ks[0], (EVENT_CLASS + 1, EMB_DIM), jnp.float32),
        # LSTM weights stored as (in, 4H) / (H, 4H); bias = b_ih + b_hh combined
        "w_ih": s * jax.random.normal(ks[1], (EMB_DIM + 1, 4 * HID_DIM), jnp.float32),
        "w_hh": s * jax.random.normal(ks[2], (HID_DIM, 4 * HID_DIM), jnp.float32),
        "b_lstm": s * jax.random.normal(ks[3], (1, 4 * HID_DIM), jnp.float32),
        # Linear layers pre-transposed to (in, out)
        "w_mlp": s * jax.random.normal(ks[4], (HID_DIM, MLP_DIM), jnp.float32),
        "b_mlp": s * jax.random.normal(ks[5], (1, MLP_DIM), jnp.float32),
        "w_ev": s * jax.random.normal(ks[6], (MLP_DIM, EVENT_CLASS), jnp.float32),
        "b_ev": s * jax.random.normal(ks[7], (1, EVENT_CLASS), jnp.float32),
        "w_tm": s * jax.random.normal(ks[8], (MLP_DIM, 1), jnp.float32),
        "b_tm": s * jax.random.normal(ks[9], (1, 1), jnp.float32),
    }

    input_time = jax.random.uniform(ks[10], (B, T), jnp.float32)
    input_events = jax.random.randint(ks[11], (B, T), 0, EVENT_CLASS + 1, jnp.int32)

    # One-time setup (outside the per-call path): pack params into one slab.
    slab, meta = prepare_params(params)
    slab = jax.device_put(slab)
    net_forward = jax.jit(make_net_forward(meta))

    time_logits, event_logits = net_forward(slab, input_time, input_events)
    jax.block_until_ready((time_logits, event_logits))

    # sanity check against pure-JAX reference
    tm_ref, ev_ref = net_forward_ref(params, input_time, input_events)
    assert time_logits.shape == (B, 1) and event_logits.shape == (B, EVENT_CLASS)
    assert jnp.allclose(time_logits, tm_ref, atol=1e-4, rtol=1e-4)
    assert jnp.allclose(event_logits, ev_ref, atol=1e-4, rtol=1e-4)

    print("KERNEL_OK")
</pallas_src>

<mosaic_0001>
module attributes {stable_mosaic.version = 11 : i64} {
  func.func @kernel(%arg0: memref<64x2xf32, #tpu.memory_space<vmem>>, %arg1: memref<224x128xf32, #tpu.memory_space<vmem>>, %arg2: memref<8x128xf32, #tpu.memory_space<vmem>>) attributes {dimension_semantics = [], scalar_prefetch = 0 : i64, scratch_operands = 0 : i64, tpu.core_type = #tpu.core_type<tc>} {
    %c0 = arith.constant 0 : index
    %c0_0 = arith.constant 0 : index
    %0 = vector.load %arg0[%c0, %c0_0] : memref<64x2xf32, #tpu.memory_space<vmem>>, vector<64x2xf32>
    %1 = vector.extract_strided_slice %0 {offsets = [0, 0], sizes = [64, 1], strides = [1, 1]} : vector<64x2xf32> to vector<64x1xf32>
    %2 = arith.fptosi %1 : vector<64x1xf32> to vector<64x1xi32>
    %3 = vector.extract_strided_slice %0 {offsets = [0, 1], sizes = [64, 1], strides = [1, 1]} : vector<64x2xf32> to vector<64x1xf32>
    %4 = tpu.iota {dimensions = array<i32: 1>} : vector<64x16xi32>
    %5 = vector.broadcast %2 : vector<64x1xi32> to vector<64x16xi32>
    %6 = arith.cmpi eq, %4, %5 : vector<64x16xi32>
    %7 = arith.extui %6 : vector<64x16xi1> to vector<64x16xi32>
    %8 = arith.sitofp %7 : vector<64x16xi32> to vector<64x16xf32>
    %c9_i32 = arith.constant 9 : i32
    %9 = vector.broadcast %c9_i32 : i32 to vector<64x16xi32>
    %10 = arith.cmpi eq, %4, %9 : vector<64x16xi32>
    %11 = vector.shape_cast %3 : vector<64x1xf32> to vector<64x1xf32>
    %12 = vector.broadcast %11 : vector<64x1xf32> to vector<64x16xf32>
    %13 = arith.select %10, %12, %8 : vector<64x16xi1>, vector<64x16xf32>
    %c10_i32 = arith.constant 10 : i32
    %14 = vector.broadcast %c10_i32 : i32 to vector<64x16xi32>
    %15 = arith.cmpi eq, %4, %14 : vector<64x16xi32>
    %cst = arith.constant 1.000000e+00 : f32
    %16 = vector.broadcast %cst : f32 to vector<64x16xf32>
    %17 = arith.select %15, %16, %13 : vector<64x16xi1>, vector<64x16xf32>
    %c0_1 = arith.constant 0 : index
    %c0_2 = arith.constant 0 : index
    %18 = vector.load %arg1[%c0_1, %c0_2] : memref<224x128xf32, #tpu.memory_space<vmem>>, vector<16x128xf32>
    %cst_3 = arith.constant dense<0.000000e+00> : vector<64x128xf32>
    %19 = tpu.matmul %17, %18, %cst_3 {dimension_numbers = #tpu.dot_dimension_numbers<[1], [0], [0], [1], [0, 0, 1, 1], [], []>} : vector<64x16xf32>, vector<16x128xf32>, vector<64x128xf32> -> vector<64x128xf32>
    %c16 = arith.constant 16 : index
    %c0_4 = arith.constant 0 : index
    %20 = vector.load %arg1[%c16, %c0_4] : memref<224x128xf32, #tpu.memory_space<vmem>>, vector<32x128xf32>
    %cst_5 = arith.constant 0.000000e+00 : f32
    %21 = vector.broadcast %cst_5 : f32 to vector<8x32xf32>
    %cst_6 = arith.constant 0.000000e+00 : f32
    %22 = vector.broadcast %cst_6 : f32 to vector<8x32xf32>
    %23 = vector.extract_strided_slice %19 {offsets = [0, 0], sizes = [8, 128], strides = [1, 1]} : vector<64x128xf32> to vector<8x128xf32>
    %cst_7 = arith.constant dense<0.000000e+00> : vector<8x128xf32>
    %24 = tpu.matmul %21, %20, %cst_7 {dimension_numbers = #tpu.dot_dimension_numbers<[1], [0], [0], [1], [0, 0, 1, 1], [], []>} : vector<8x32xf32>, vector<32x128xf32>, vector<8x128xf32> -> vector<8x128xf32>
    %25 = arith.addf %23, %24 : vector<8x128xf32>
    %26 = arith.negf %25 : vector<8x128xf32>
    %27 = math.exp %26 : vector<8x128xf32>
    %cst_8 = arith.constant 1.000000e+00 : f32
    %28 = vector.broadcast %cst_8 : f32 to vector<8x128xf32>
    %29 = arith.addf %28, %27 : vector<8x128xf32>
    %30 = arith.divf %28, %29 : vector<8x128xf32>
    %31 = math.tanh %25 : vector<8x128xf32>
    %32 = vector.extract_strided_slice %30 {offsets = [0, 0], sizes = [8, 32], strides = [1, 1]} : vector<8x128xf32> to vector<8x32xf32>
    %33 = vector.extract_strided_slice %30 {offsets = [0, 32], sizes = [8, 32], strides = [1, 1]} : vector<8x128xf32> to vector<8x32xf32>
    %34 = vector.extract_strided_slice %31 {offsets = [0, 64], sizes = [8, 32], strides = [1, 1]} : vector<8x128xf32> to vector<8x32xf32>
    %35 = vector.extract_strided_slice %30 {offsets = [0, 96], sizes = [8, 32], strides = [1, 1]} : vector<8x128xf32> to vector<8x32xf32>
    %36 = arith.mulf %33, %22 : vector<8x32xf32>
    %37 = arith.mulf %32, %34 : vector<8x32xf32>
    %38 = arith.addf %36, %37 : vector<8x32xf32>
    %39 = math.tanh %38 : vector<8x32xf32>
    %40 = arith.mulf %35, %39 : vector<8x32xf32>
    %41 = vector.extract_strided_slice %19 {offsets = [8, 0], sizes = [8, 128], strides = [1, 1]} : vector<64x128xf32> to vector<8x128xf32>
    %cst_9 = arith.constant dense<0.000000e+00> : vector<8x128xf32>
    %42 = tpu.matmul %40, %20, %cst_9 {dimension_numbers = #tpu.dot_dimension_numbers<[1], [0], [0], [1], [0, 0, 1, 1], [], []>} : vector<8x32xf32>, vector<32x128xf32>, vector<8x128xf32> -> vector<8x128xf32>
    %43 = arith.addf %41, %42 : vector<8x128xf32>
    %44 = arith.negf %43 : vector<8x128xf32>
    %45 = math.exp %44 : vector<8x128xf32>
    %cst_10 = arith.constant 1.000000e+00 : f32
    %46 = vector.broadcast %cst_10 : f32 to vector<8x128xf32>
    %47 = arith.addf %46, %45 : vector<8x128xf32>
    %48 = arith.divf %46, %47 : vector<8x128xf32>
    %49 = math.tanh %43 : vector<8x128xf32>
    %50 = vector.extract_strided_slice %48 {offsets = [0, 0], sizes = [8, 32], strides = [1, 1]} : vector<8x128xf32> to vector<8x32xf32>
    %51 = vector.extract_strided_slice %48 {offsets = [0, 32], sizes = [8, 32], strides = [1, 1]} : vector<8x128xf32> to vector<8x32xf32>
    %52 = vector.extract_strided_slice %49 {offsets = [0, 64], sizes = [8, 32], strides = [1, 1]} : vector<8x128xf32> to vector<8x32xf32>
    %53 = vector.extract_strided_slice %48 {offsets = [0, 96], sizes = [8, 32], strides = [1, 1]} : vector<8x128xf32> to vector<8x32xf32>
    %54 = arith.mulf %51, %38 : vector<8x32xf32>
    %55 = arith.mulf %50, %52 : vector<8x32xf32>
    %56 = arith.addf %54, %55 : vector<8x32xf32>
    %57 = math.tanh %56 : vector<8x32xf32>
    %58 = arith.mulf %53, %57 : vector<8x32xf32>
    %59 = vector.extract_strided_slice %19 {offsets = [16, 0], sizes = [8, 128], strides = [1, 1]} : vector<64x128xf32> to vector<8x128xf32>
    %cst_11 = arith.constant dense<0.000000e+00> : vector<8x128xf32>
    %60 = tpu.matmul %58, %20, %cst_11 {dimension_numbers = #tpu.dot_dimension_numbers<[1], [0], [0], [1], [0, 0, 1, 1], [], []>} : vector<8x32xf32>, vector<32x128xf32>, vector<8x128xf32> -> vector<8x128xf32>
    %61 = arith.addf %59, %60 : vector<8x128xf32>
    %62 = arith.negf %61 : vector<8x128xf32>
    %63 = math.exp %62 : vector<8x128xf32>
    %cst_12 = arith.constant 1.000000e+00 : f32
    %64 = vector.broadcast %cst_12 : f32 to vector<8x128xf32>
    %65 = arith.addf %64, %63 : vector<8x128xf32>
    %66 = arith.divf %64, %65 : vector<8x128xf32>
    %67 = math.tanh %61 : vector<8x128xf32>
    %68 = vector.extract_strided_slice %66 {offsets = [0, 0], sizes = [8, 32], strides = [1, 1]} : vector<8x128xf32> to vector<8x32xf32>
    %69 = vector.extract_strided_slice %66 {offsets = [0, 32], sizes = [8, 32], strides = [1, 1]} : vector<8x128xf32> to vector<8x32xf32>
    %70 = vector.extract_strided_slice %67 {offsets = [0, 64], sizes = [8, 32], strides = [1, 1]} : vector<8x128xf32> to vector<8x32xf32>
    %71 = vector.extract_strided_slice %66 {offsets = [0, 96], sizes = [8, 32], strides = [1, 1]} : vector<8x128xf32> to vector<8x32xf32>
    %72 = arith.mulf %69, %56 : vector<8x32xf32>
    %73 = arith.mulf %68, %70 : vector<8x32xf32>
    %74 = arith.addf %72, %73 : vector<8x32xf32>
    %75 = math.tanh %74 : vector<8x32xf32>
    %76 = arith.mulf %71, %75 : vector<8x32xf32>
    %77 = vector.extract_strided_slice %19 {offsets = [24, 0], sizes = [8, 128], strides = [1, 1]} : vector<64x128xf32> to vector<8x128xf32>
    %cst_13 = arith.constant dense<0.000000e+00> : vector<8x128xf32>
    %78 = tpu.matmul %76, %20, %cst_13 {dimension_numbers = #tpu.dot_dimension_numbers<[1], [0], [0], [1], [0, 0, 1, 1], [], []>} : vector<8x32xf32>, vector<32x128xf32>, vector<8x128xf32> -> vector<8x128xf32>
    %79 = arith.addf %77, %78 : vector<8x128xf32>
    %80 = arith.negf %79 : vector<8x128xf32>
    %81 = math.exp %80 : vector<8x128xf32>
    %cst_14 = arith.constant 1.000000e+00 : f32
    %82 = vector.broadcast %cst_14 : f32 to vector<8x128xf32>
    %83 = arith.addf %82, %81 : vector<8x128xf32>
    %84 = arith.divf %82, %83 : vector<8x128xf32>
    %85 = math.tanh %79 : vector<8x128xf32>
    %86 = vector.extract_strided_slice %84 {offsets = [0, 0], sizes = [8, 32], strides = [1, 1]} : vector<8x128xf32> to vector<8x32xf32>
    %87 = vector.extract_strided_slice %84 {offsets = [0, 32], sizes = [8, 32], strides = [1, 1]} : vector<8x128xf32> to vector<8x32xf32>
    %88 = vector.extract_strided_slice %85 {offsets = [0, 64], sizes = [8, 32], strides = [1, 1]} : vector<8x128xf32> to vector<8x32xf32>
    %89 = vector.extract_strided_slice %84 {offsets = [0, 96], sizes = [8, 32], strides = [1, 1]} : vector<8x128xf32> to vector<8x32xf32>
    %90 = arith.mulf %87, %74 : vector<8x32xf32>
    %91 = arith.mulf %86, %88 : vector<8x32xf32>
    %92 = arith.addf %90, %91 : vector<8x32xf32>
    %93 = math.tanh %92 : vector<8x32xf32>
    %94 = arith.mulf %89, %93 : vector<8x32xf32>
    %95 = vector.extract_strided_slice %19 {offsets = [32, 0], sizes = [8, 128], strides = [1, 1]} : vector<64x128xf32> to vector<8x128xf32>
    %cst_15 = arith.constant dense<0.000000e+00> : vector<8x128xf32>
    %96 = tpu.matmul %94, %20, %cst_15 {dimension_numbers = #tpu.dot_dimension_numbers<[1], [0], [0], [1], [0, 0, 1, 1], [], []>} : vector<8x32xf32>, vector<32x128xf32>, vector<8x128xf32> -> vector<8x128xf32>
    %97 = arith.addf %95, %96 : vector<8x128xf32>
    %98 = arith.negf %97 : vector<8x128xf32>
    %99 = math.exp %98 : vector<8x128xf32>
    %cst_16 = arith.constant 1.000000e+00 : f32
    %100 = vector.broadcast %cst_16 : f32 to vector<8x128xf32>
    %101 = arith.addf %100, %99 : vector<8x128xf32>
    %102 = arith.divf %100, %101 : vector<8x128xf32>
    %103 = math.tanh %97 : vector<8x128xf32>
    %104 = vector.extract_strided_slice %102 {offsets = [0, 0], sizes = [8, 32], strides = [1, 1]} : vector<8x128xf32> to vector<8x32xf32>
    %105 = vector.extract_strided_slice %102 {offsets = [0, 32], sizes = [8, 32], strides = [1, 1]} : vector<8x128xf32> to vector<8x32xf32>
    %106 = vector.extract_strided_slice %103 {offsets = [0, 64], sizes = [8, 32], strides = [1, 1]} : vector<8x128xf32> to vector<8x32xf32>
    %107 = vector.extract_strided_slice %102 {offsets = [0, 96], sizes = [8, 32], strides = [1, 1]} : vector<8x128xf32> to vector<8x32xf32>
    %108 = arith.mulf %105, %92 : vector<8x32xf32>
    %109 = arith.mulf %104, %106 : vector<8x32xf32>
    %110 = arith.addf %108, %109 : vector<8x32xf32>
    %111 = math.tanh %110 : vector<8x32xf32>
    %112 = arith.mulf %107, %111 : vector<8x32xf32>
    %113 = vector.extract_strided_slice %19 {offsets = [40, 0], sizes = [8, 128], strides = [1, 1]} : vector<64x128xf32> to vector<8x128xf32>
    %cst_17 = arith.constant dense<0.000000e+00> : vector<8x128xf32>
    %114 = tpu.matmul %112, %20, %cst_17 {dimension_numbers = #tpu.dot_dimension_numbers<[1], [0], [0], [1], [0, 0, 1, 1], [], []>} : vector<8x32xf32>, vector<32x128xf32>, vector<8x128xf32> -> vector<8x128xf32>
    %115 = arith.addf %113, %114 : vector<8x128xf32>
    %116 = arith.negf %115 : vector<8x128xf32>
    %117 = math.exp %116 : vector<8x128xf32>
    %cst_18 = arith.constant 1.000000e+00 : f32
    %118 = vector.broadcast %cst_18 : f32 to vector<8x128xf32>
    %119 = arith.addf %118, %117 : vector<8x128xf32>
    %120 = arith.divf %118, %119 : vector<8x128xf32>
    %121 = math.tanh %115 : vector<8x128xf32>
    %122 = vector.extract_strided_slice %120 {offsets = [0, 0], sizes = [8, 32], strides = [1, 1]} : vector<8x128xf32> to vector<8x32xf32>
    %123 = vector.extract_strided_slice %120 {offsets = [0, 32], sizes = [8, 32], strides = [1, 1]} : vector<8x128xf32> to vector<8x32xf32>
    %124 = vector.extract_strided_slice %121 {offsets = [0, 64], sizes = [8, 32], strides = [1, 1]} : vector<8x128xf32> to vector<8x32xf32>
    %125 = vector.extract_strided_slice %120 {offsets = [0, 96], sizes = [8, 32], strides = [1, 1]} : vector<8x128xf32> to vector<8x32xf32>
    %126 = arith.mulf %123, %110 : vector<8x32xf32>
    %127 = arith.mulf %122, %124 : vector<8x32xf32>
    %128 = arith.addf %126, %127 : vector<8x32xf32>
    %129 = math.tanh %128 : vector<8x32xf32>
    %130 = arith.mulf %125, %129 : vector<8x32xf32>
    %131 = vector.extract_strided_slice %19 {offsets = [48, 0], sizes = [8, 128], strides = [1, 1]} : vector<64x128xf32> to vector<8x128xf32>
    %cst_19 = arith.constant dense<0.000000e+00> : vector<8x128xf32>
    %132 = tpu.matmul %130, %20, %cst_19 {dimension_numbers = #tpu.dot_dimension_numbers<[1], [0], [0], [1], [0, 0, 1, 1], [], []>} : vector<8x32xf32>, vector<32x128xf32>, vector<8x128xf32> -> vector<8x128xf32>
    %133 = arith.addf %131, %132 : vector<8x128xf32>
    %134 = arith.negf %133 : vector<8x128xf32>
    %135 = math.exp %134 : vector<8x128xf32>
    %cst_20 = arith.constant 1.000000e+00 : f32
    %136 = vector.broadcast %cst_20 : f32 to vector<8x128xf32>
    %137 = arith.addf %136, %135 : vector<8x128xf32>
    %138 = arith.divf %136, %137 : vector<8x128xf32>
    %139 = math.tanh %133 : vector<8x128xf32>
    %140 = vector.extract_strided_slice %138 {offsets = [0, 0], sizes = [8, 32], strides = [1, 1]} : vector<8x128xf32> to vector<8x32xf32>
    %141 = vector.extract_strided_slice %138 {offsets = [0, 32], sizes = [8, 32], strides = [1, 1]} : vector<8x128xf32> to vector<8x32xf32>
    %142 = vector.extract_strided_slice %139 {offsets = [0, 64], sizes = [8, 32], strides = [1, 1]} : vector<8x128xf32> to vector<8x32xf32>
    %143 = vector.extract_strided_slice %138 {offsets = [0, 96], sizes = [8, 32], strides = [1, 1]} : vector<8x128xf32> to vector<8x32xf32>
    %144 = arith.mulf %141, %128 : vector<8x32xf32>
    %145 = arith.mulf %140, %142 : vector<8x32xf32>
    %146 = arith.addf %144, %145 : vector<8x32xf32>
    %147 = math.tanh %146 : vector<8x32xf32>
    %148 = arith.mulf %143, %147 : vector<8x32xf32>
    %149 = vector.extract_strided_slice %19 {offsets = [56, 0], sizes = [8, 128], strides = [1, 1]} : vector<64x128xf32> to vector<8x128xf32>
    %cst_21 = arith.constant dense<0.000000e+00> : vector<8x128xf32>
    %150 = tpu.matmul %148, %20, %cst_21 {dimension_numbers = #tpu.dot_dimension_numbers<[1], [0], [0], [1], [0, 0, 1, 1], [], []>} : vector<8x32xf32>, vector<32x128xf32>, vector<8x128xf32> -> vector<8x128xf32>
    %151 = arith.addf %149, %150 : vector<8x128xf32>
    %152 = arith.negf %151 : vector<8x128xf32>
    %153 = math.exp %152 : vector<8x128xf32>
    %cst_22 = arith.constant 1.000000e+00 : f32
    %154 = vector.broadcast %cst_22 : f32 to vector<8x128xf32>
    %155 = arith.addf %154, %153 : vector<8x128xf32>
    %156 = arith.divf %154, %155 : vector<8x128xf32>
    %157 = math.tanh %151 : vector<8x128xf32>
    %158 = vector.extract_strided_slice %156 {offsets = [0, 0], sizes = [8, 32], strides = [1, 1]} : vector<8x128xf32> to vector<8x32xf32>
    %159 = vector.extract_strided_slice %156 {offsets = [0, 32], sizes = [8, 32], strides = [1, 1]} : vector<8x128xf32> to vector<8x32xf32>
    %160 = vector.extract_strided_slice %157 {offsets = [0, 64], sizes = [8, 32], strides = [1, 1]} : vector<8x128xf32> to vector<8x32xf32>
    %161 = vector.extract_strided_slice %156 {offsets = [0, 96], sizes = [8, 32], strides = [1, 1]} : vector<8x128xf32> to vector<8x32xf32>
    %162 = arith.mulf %159, %146 : vector<8x32xf32>
    %163 = arith.mulf %158, %160 : vector<8x32xf32>
    %164 = arith.addf %162, %163 : vector<8x32xf32>
    %165 = math.tanh %164 : vector<8x32xf32>
    %166 = arith.mulf %161, %165 : vector<8x32xf32>
    %c48 = arith.constant 48 : index
    %c0_23 = arith.constant 0 : index
    %167 = vector.load %arg1[%c48, %c0_23] : memref<224x128xf32, #tpu.memory_space<vmem>>, vector<32x128xf32>
    %c80 = arith.constant 80 : index
    %c0_24 = arith.constant 0 : index
    %168 = vector.load %arg1[%c80, %c0_24] : memref<224x128xf32, #tpu.memory_space<vmem>>, vector<1x128xf32>
    %cst_25 = arith.constant dense<0.000000e+00> : vector<8x128xf32>
    %169 = tpu.matmul %166, %167, %cst_25 {dimension_numbers = #tpu.dot_dimension_numbers<[1], [0], [0], [1], [0, 0, 1, 1], [], []>} : vector<8x32xf32>, vector<32x128xf32>, vector<8x128xf32> -> vector<8x128xf32>
    %170 = vector.broadcast %168 : vector<1x128xf32> to vector<8x128xf32>
    %171 = arith.addf %169, %170 : vector<8x128xf32>
    %172 = math.tanh %171 : vector<8x128xf32>
    %c88 = arith.constant 88 : index
    %c0_26 = arith.constant 0 : index
    %173 = vector.load %arg1[%c88, %c0_26] : memref<224x128xf32, #tpu.memory_space<vmem>>, vector<128x128xf32>
    %c216 = arith.constant 216 : index
    %c0_27 = arith.constant 0 : index
    %174 = vector.load %arg1[%c216, %c0_27] : memref<224x128xf32, #tpu.memory_space<vmem>>, vector<1x128xf32>
    %cst_28 = arith.constant dense<0.000000e+00> : vector<8x128xf32>
    %175 = tpu.matmul %172, %173, %cst_28 {dimension_numbers = #tpu.dot_dimension_numbers<[1], [0], [0], [1], [0, 0, 1, 1], [], []>} : vector<8x128xf32>, vector<128x128xf32>, vector<8x128xf32> -> vector<8x128xf32>
    %176 = vector.broadcast %174 : vector<1x128xf32> to vector<8x128xf32>
    %177 = arith.addf %175, %176 : vector<8x128xf32>
    %c0_29 = arith.constant 0 : index
    %c0_30 = arith.constant 0 : index
    %178 = vector.load %arg2[%c0_29, %c0_30] : memref<8x128xf32, #tpu.memory_space<vmem>>, vector<8x128xf32>
    tpu.vector_store %arg2[%c0_29, %c0_30], %177 {strides = array<i32>} : memref<8x128xf32, #tpu.memory_space<vmem>>, vector<8x128xf32>,
    return
  }
}

</mosaic_0001>

<bundles_post_ra>
// kernel: net_forward.1
= control target key start
LH: loop header
LB: loop body
LE: loop exit
PB: predicated region body
PF: predicated region fallthrough
CT: control target
= control target key end

     0   :  { %7 = vsyncpa [#allocation3], 0  ;;  %s1643_s9 = smov [#allocation2]   ;;  %s1933_s0 = inlined_call_operand.vmem [shape: f32[64,2], index: 0, kind: input, shape index: {}]   ;;  %s1934_s1 = inlined_call_operand.hbm [shape: f32[224,128], index: 1, kind: input, shape index: {}]   ;;  %s1935_s2 = inlined_call_operand.vmem [shape: f32[8,128], index: 2, kind: output, shape index: {}]  }
   0x1   :  { %s15_s10 = sshll.u32 %s1643_s9, 4  ;;  %s16_s10 = int_to_ptr.vmem [resolvable:$true] %s15_s10 }
   0x2   :  { %s1629_s11 = scalar_lea.vmem %s16_s10, 3584  ;;  %p1634_p1 = scmp.lt.s32.totalorder %s16_s10, %s16_s10 }
   0x3   :  { %p1630_p0 = scmp.ne.s32.totalorder %s16_s10, %s1629_s11  ;;  %p1635_p2 = scmp.lt.s32.totalorder %s1629_s11, %s1629_s11 }
   0x5   :  { %p1636_p3 = por %p1635_p2, %p1634_p1 }
   0x7   :  { %p1637_p4 = pnand %p1636_p3, %p1630_p0 }
   0x9   :  { %1640 = shalt.err (!%p1637_p4)
}
   0xa   :  { %s1644_s12 = smov 128   ;;  %s1645_s13 = smov 8  }
   0xb   :  { %21 = dma.hbm_to_vmem [thread:$0]  %s1934_s1, 3584, %s16_s10, [#allocation3], %s1644_s12, %s1644_s12, %s1645_s13  }
   0xc   :  { %1641 = dma.done.wait [#allocation3], 3584  }
   0xd   :  { %1642 = vsyncadd [#allocation3], 4294963712  ;;  %v1646_v0 = vmov 1   ;;  %v27_v1 = vld [vmem:[%s1933_s0 + $0x10] sm:$0xff]  ;;  %v25_v2 = vld [vmem:[%s1933_s0] sm:$0xff]  ;;  %v1647_v6 = vmov 0.0   ;;  %v41_v33 = vlaneseq }
   0xe   :  { %1548 = vset.pattern.permute.xlu0 %v1646_v0  ;;  %1547 = vset.pattern.permute.xlu1 %v1646_v0  ;;  %v26_v3 = vld [vmem:[%s1933_s0 + $0x8] sm:$0xff]  ;;  %v1522_v4 = vtrunc.f32 %v25_v2  ;;  %v28_v8 = vld [vmem:[%s1933_s0 + $0x18] sm:$0xff]  ;;  %v1648_v9 = vmov 0   ;;  %v1526_v11 = vtrunc.f32 %v27_v1  ;;  %v29_v14 = vld [vmem:[%s1933_s0 + $0x20] sm:$0xff]  ;;  %vm1649_vm0 = vmmov 0   ;;  %s1651_s3 = smov 32  }
   0xf   :  { %104 = vperm.xlu0 %1548, %v27_v1   ;;  %94 = vperm.xlu1 %1547, %v25_v2   ;;  %v1524_v5 = vtrunc.f32 %v26_v3  ;;  %v150_v10 = vld [vmem:[#allocation2 + $0x8] sm:$0xff]  ;;  %v1528_v13 = vtrunc.f32 %v28_v8  ;;  %v149_v16 = vld [vmem:[#allocation2] sm:$0xff]  ;;  %v1530_v19 = vtrunc.f32 %v29_v14  ;;  %v31_v21 = vld [vmem:[%s1933_s0 + $0x30] sm:$0xff]  ;;  %v1719_v36 = vand.u32 127, %v41_v33 }
  0x10   :  { %1421 = vmatprep.subr.mxu1 %v1647_v6  ;;  %v1523_v7 = vcvt.f32.s32 %v1522_v4  ;;  %1372 = vmatprep.subr.mxu0 %v150_v10  ;;  %v30_v15 = vld [vmem:[%s1933_s0 + $0x28] sm:$0xff]  ;;  %v1527_v17 = vcvt.f32.s32 %v1526_v11  ;;  %v1534_v24 = vtrunc.f32 %v31_v21  ;;  %v32_v26 = vld [vmem:[%s1933_s0 + $0x38] sm:$0xff]  ;;  %v1704_v30 = vld [vmem:[#allocation2 + $0x20] sm:$0xff]  ;;  %vm151_vm4 = vcmask 130048   ;;  %s1650_s0 = smov 64  }
  0x11   :  { %v1525_v12 = vcvt.f32.s32 %v1524_v5  ;;  %1373 = vmatpush3.msra.mxu0 %v150_v10  ;;  %v1529_v18 = vcvt.f32.s32 %v1528_v13  ;;  %v1532_v20 = vtrunc.f32 %v30_v15  ;;  %v1531_v22 = vcvt.f32.s32 %v1530_v19  ;;  %v1699_v28 = vld [vmem:[#allocation2 + $0x28] sm:$0xff]  ;;  %v1707_v31 = vld [vmem:[#allocation2 + $0x18] sm:$0xff]  ;;  %v1712_v32 = vld [vmem:[#allocation2 + $0x10] sm:$0xff]  ;;  %1429 = vmatprep.mubr.msk.f32.mxu1 %vm1649_vm0, %v1647_v6 }
  0x12   :  { %1374 = vmatprep.subr.mxu0 %v149_v16  ;;  %v1535_v25 = vcvt.f32.s32 %v1534_v24  ;;  %v1536_v27 = vtrunc.f32 %v32_v26  ;;  %1422 = vmatpush3.msra.mxu1 %v1699_v28  ;;  %vm91_vm1 = vcmp.eq.s32.totalorder %v1719_v36, 9  ;;  %vm140_vm3 = vcmp.eq.s32.totalorder %v1719_v36, 10 }
  0x13   :  { %1549 = vset.pattern.permute.xlu0 %v1648_v9  ;;  %99 = vperm.xlu1 %1547, %v26_v3   ;;  %v1533_v23 = vcvt.f32.s32 %v1532_v20  ;;  %vm285_vm12 = vcmask 261120  }
  0x14   :  { %44 = vperm.xlu0 %1549, %v1523_v7   ;;  %1375 = vmatpush3.msra.mxu0 %v149_v16  ;;  %v1537_v29 = vcvt.f32.s32 %v1536_v27 }
  0x15   :  { %1388 = vmatprep.subr.mxu0 %v1647_v6  ;;  %1423 = vmatprep.subr.mxu1 %v1647_v6 }
  0x16   :  { %1424 = vmatpush3.msra.mxu1 %v1704_v30 }
  0x17   :  { %109 = vperm.xlu1 %1547, %v28_v8   ;;  %1425 = vmatprep.subr.mxu1 %v1647_v6 }
  0x18   :  { %47 = vperm.xlu0 %1549, %v1525_v12   ;;  %1426 = vmatpush3.msra.mxu1 %v1707_v31 }
  0x19   :  { %1427 = vmatprep.subr.mxu1 %v1647_v6 }
  0x1a   :  { %1428 = vmatpush3.msra.mxu1 %v1712_v32 }
  0x1b   :  { %1550 = vset.pattern.permute.xlu1 %v1648_v9  ;;  %1443 = vmatprep.subr.mxu1 %v1647_v6 }
  0x1c   :  { %53 = vperm.xlu1 %1550, %v1529_v18   ;;  %50 = vperm.xlu0 %1549, %v1527_v17  }
  0x20   :  { %56 = vperm.xlu1 %1550, %v1531_v22   ;;  %59 = vperm.xlu0 %1549, %v1533_v23  }
  0x24   :  { %1551 = vset.pattern.permute.xlu1 %v1646_v0  ;;  %62 = vperm.xlu0 %1549, %v1535_v25  }
  0x25   :  { %114 = vperm.xlu1 %1551, %v29_v14  }
  0x28   :  { %1553 = vset.pattern.permute.xlu0 %v1646_v0 }
  0x29   :  { %119 = vperm.xlu1 %1551, %v30_v15   ;;  %124 = vperm.xlu0 %1553, %v31_v21  }
  0x2d   :  { %1552 = vset.pattern.permute.xlu1 %v1648_v9 }
  0x2e   :  { %65 = vperm.xlu1 %1552, %v1537_v29  }
  0x32   :  { %1554 = vset.pattern.permute.xlu1 %v1646_v0 }
  0x33   :  { %129 = vperm.xlu1 %1554, %v32_v26  }
  0x8a   :  { %v95_v34 = vpop.permute.xlu1 %94  ;;  %v105_v35 = vpop.permute.xlu0 %104 }
  0x8e   :  { %v100_v37 = vpop.permute.xlu1 %99 }
  0x8f   :  { %v45_v38 = vpop.permute.xlu0 %44 }
  0x90   :  { %vm67_vm2 = vcmp.eq.s32.totalorder %v1719_v36, %v45_v38 }
  0x91   :  { %v1266_v39 = vsel %vm67_vm2, 1.0, %v1647_v6 }
  0x92   :  { %v110_v40 = vpop.permute.xlu1 %109  ;;  %v132_v41 = vsel %vm91_vm1, %v95_v34, %v1266_v39 }
  0x93   :  { %v48_v42 = vpop.permute.xlu0 %47  ;;  %v141_v43 = vsel %vm140_vm3, 1.0, %v132_v41 }
  0x94   :  { %vm68_vm5 = vcmp.eq.s32.totalorder %v1719_v36, %v48_v42  ;;  %1376 = vmatprep.mubr.msk.f32.mxu0 %vm151_vm4, %v141_v43 }
  0x95   :  { %v1267_v44 = vsel %vm68_vm5, 1.0, %v1647_v6 }
  0x96   :  { %v133_v45 = vsel %vm91_vm1, %v100_v37, %v1267_v44 }
  0x97   :  { %v54_v46 = vpop.permute.xlu1 %53  ;;  %v51_v47 = vpop.permute.xlu0 %50  ;;  %v142_v48 = vsel %vm140_vm3, 1.0, %v133_v45 }
  0x98   :  { %vm70_vm6 = vcmp.eq.s32.totalorder %v1719_v36, %v54_v46  ;;  %vm69_vm7 = vcmp.eq.s32.totalorder %v1719_v36, %v51_v47  ;;  %1377 = vmatmul.mubr.msk.f32.vlgmr.msra.gmra.mxu0 %vm151_vm4, %v142_v48 }
  0x99   :  { %v1269_v49 = vsel %vm70_vm6, 1.0, %v1647_v6  ;;  %v1268_v50 = vsel %vm69_vm7, 1.0, %v1647_v6  ;;  %1389 = vmatpush3.msra.mxu0 %v1699_v28 }
  0x9a   :  { %v135_v51 = vsel %vm91_vm1, %v110_v40, %v1269_v49  ;;  %v134_v52 = vsel %vm91_vm1, %v105_v35, %v1268_v50  ;;  %1390 = vmatprep.subr.mxu0 %v1647_v6 }
  0x9b   :  { %v57_v53 = vpop.permute.xlu1 %56  ;;  %v60_v54 = vpop.permute.xlu0 %59  ;;  %v143_v55 = vsel %vm140_vm3, 1.0, %v134_v52  ;;  %v144_v56 = vsel %vm140_vm3, 1.0, %v135_v51  ;;  %1391 = vmatpush3.msra.mxu0 %v1704_v30 }
  0x9c   :  { %1379 = vmatprep.mubr.msk.f32.mxu0 %vm151_vm4, %v143_v55  ;;  %1392 = vmatprep.subr.mxu0 %v1647_v6  ;;  %vm71_vm8 = vcmp.eq.s32.totalorder %v1719_v36, %v57_v53  ;;  %vm72_vm9 = vcmp.eq.s32.totalorder %v1719_v36, %v60_v54 }
  0x9d   :  { %1380 = vmatmul.mubr.msk.f32.gmra.mxu0 %vm151_vm4, %v144_v56  ;;  %v1270_v58 = vsel %vm71_vm8, 1.0, %v1647_v6  ;;  %v1271_v62 = vsel %vm72_vm9, 1.0, %v1647_v6 }
  0x9e   :  { %1393 = vmatpush3.msra.mxu0 %v1707_v31 }
  0x9f   :  { %v63_v57 = vpop.permute.xlu0 %62  ;;  %1394 = vmatprep.subr.mxu0 %v1647_v6 }
  0xa0   :  { %v115_v59 = vpop.permute.xlu1 %114  ;;  %1395 = vmatpush3.msra.mxu0 %v1712_v32  ;;  %vm73_vm10 = vcmp.eq.s32.totalorder %v1719_v36, %v63_v57 }
  0xa1   :  { %v136_v60 = vsel %vm91_vm1, %v115_v59, %v1270_v58  ;;  %1399 = vmatprep.subr.mxu0 %v1647_v6  ;;  %v1272_v63 = vsel %vm73_vm10, 1.0, %v1647_v6 }
  0xa2   :  { %v145_v61 = vsel %vm140_vm3, 1.0, %v136_v60 }
  0xa3   :  { %1382 = vmatprep.mubr.msk.f32.mxu0 %vm151_vm4, %v145_v61 }
  0xa4   :  { %v120_v0 = vpop.permute.xlu1 %119  ;;  %v125_v1 = vpop.permute.xlu0 %124 }
  0xa5   :  { %v137_v2 = vsel %vm91_vm1, %v120_v0, %v1271_v62  ;;  %v138_v3 = vsel %vm91_vm1, %v125_v1, %v1272_v63 }
  0xa6   :  { %v146_v4 = vsel %vm140_vm3, 1.0, %v137_v2  ;;  %v147_v5 = vsel %vm140_vm3, 1.0, %v138_v3 }
  0xa7   :  { %1383 = vmatmul.mubr.msk.f32.gmra.mxu0 %vm151_vm4, %v146_v4 }
  0xa8   :  { %1385 = vmatprep.mubr.msk.f32.mxu0 %vm151_vm4, %v147_v5 }
  0xa9   :  { %v66_v7 = vpop.permute.xlu1 %65 }
  0xaa   :  { %vm74_vm11 = vcmp.eq.s32.totalorder %v1719_v36, %v66_v7 }
  0xab   :  { %v1273_v8 = vsel %vm74_vm11, 1.0, %v1647_v6 }
  0xae   :  { %v130_v9 = vpop.permute.xlu1 %129 }
  0xaf   :  { %v139_v10 = vsel %vm91_vm1, %v130_v9, %v1273_v8 }
  0xb0   :  { %v148_v11 = vsel %vm140_vm3, 1.0, %v139_v10 }
  0xb1   :  { %1386 = vmatmul.mubr.msk.f32.gmra.mxu0 %vm151_vm4, %v148_v11 }
  0xb2   :  { %1396 = vmatprep.mubr.msk.f32.mxu0 %vm1649_vm0, %v1647_v6 }
  0xb5   :  { %1397 = vmatmul.mubr.f32.vlgmr.msra.gmra.mxu0 %v1647_v6 }
  0xb6   :  { %1400 = vmatpush3.msra.mxu0 %v1699_v28  ;;  %1407 = vmatprep.mubr.msk.f32.mxu0 %vm1649_vm0, %v1647_v6 }
  0xb7   :  { %1401 = vmatprep.subr.mxu0 %v1647_v6 }
  0xb8   :  { %1402 = vmatpush3.msra.mxu0 %v1704_v30 }
  0xb9   :  { %1403 = vmatprep.subr.mxu0 %v1647_v6 }
  0xba   :  { %1404 = vmatpush3.msra.mxu0 %v1707_v31 }
  0xbb   :  { %1405 = vmatprep.subr.mxu0 %v1647_v6 }
  0xbc   :  { %1406 = vmatpush3.msra.mxu0 %v1712_v32 }
  0xbd   :  { %1410 = vmatprep.subr.mxu0 %v1647_v6 }
 0x158   :  { %v1378_v12 = vpop.f32.mrf.mxu0 }
 0x15a   :  { %v242_v13 = vpop.f32.mrf.mxu0 }
 0x15d   :  { %v1800_v14 = vpop.f32.mrf.mxu0 }
 0x15f   :  { %v1802_v15 = vpop.f32.mrf.mxu0 }
 0x167   :  { %v1804_v16 = vpop.f32.mrf.mxu0 }
 0x169   :  { %v1806_v17 = vpop.f32.mrf.mxu0 }
 0x171   :  { %v1808_v18 = vpop.f32.mrf.mxu0 }
 0x173   :  { %v1810_v19 = vpop.f32.mrf.mxu0 }
 0x175   :  { %v355_v20 = vpop.f32.mrf.mxu0 }
 0x176   :  { %v359_v21 = vadd.f32 %v355_v20, %v242_v13 }
 0x177   :  { %v1398_v22 = vpop.f32.mrf.mxu0 }
 0x178   :  { %1555 = vtanh.f32 %v359_v21  ;;  %v1282_v24 = vmul.f32 -1.442695, %v359_v21 }
 0x17a   :  { %1557 = vpow2.f32 %v1282_v24 }
 0x185   :  { %v1556_v23 = vpop.eup %1555 }
 0x186   :  { %369 = vrot.lane.b32.xlu1 %v1556_v23, %s1650_s0 }
 0x187   :  { %v1558_v25 = vpop.eup %1557 }
 0x188   :  { %v363_v26 = vadd.f32 1.0, %v1558_v25 }
 0x18a   :  { %1559 = vrcp.f32 %v363_v26 }
 0x197   :  { %v1560_v27 = vpop.eup %1559 }
 0x198   :  { %v367_v34 = vmul.f32 0.0, %v1560_v27 }
 0x1f8   :  { %v370_v29 = vpop.permute.xlu1 %369 }
 0x1f9   :  { %v372_v33 = vmul.f32 %v1560_v27, %v370_v29 }
 0x1fb   :  { %374 = vrot.lane.b32.xlu0 %v372_v33, %s1651_s3 }
 0x26d   :  { %v375_v35 = vpop.permute.xlu0 %374 }
 0x26e   :  { %v377_v36 = vadd.f32 %v375_v35, %v367_v34 }
 0x270   :  { %1561 = vtanh.f32 %v377_v36 }
 0x27d   :  { %v1562_v37 = vpop.eup %1561 }
 0x27e   :  { %380 = vrot.lane.b32.xlu1 %v1562_v37, %s1650_s0 }
 0x2f0   :  { %v381_v38 = vpop.permute.xlu1 %380 }
 0x2f1   :  { %v383_v39 = vmul.f32 %v1560_v27, %v381_v38 }
 0x2f3   :  { %385 = vrot.lane.b32.xlu0 %v383_v39, %s1651_s3 }
 0x365   :  { %v386_v40 = vpop.permute.xlu0 %385 }
 0x366   :  { %1408 = vmatmul.mubr.msk.f32.vlgmr.msra.gmra.mxu0 %vm285_vm12, %v386_v40 }
 0x367   :  { %1411 = vmatpush3.msra.mxu0 %v1699_v28  ;;  %1418 = vmatprep.mubr.msk.f32.mxu0 %vm1649_vm0, %v1647_v6 }
 0x368   :  { %1412 = vmatprep.subr.mxu0 %v1647_v6 }
 0x369   :  { %1413 = vmatpush3.msra.mxu0 %v1704_v30 }
 0x36a   :  { %1414 = vmatprep.subr.mxu0 %v1647_v6 }
 0x36b   :  { %1415 = vmatpush3.msra.mxu0 %v1707_v31 }
 0x36c   :  { %1416 = vmatprep.subr.mxu0 %v1647_v6 }
 0x36d   :  { %1417 = vmatpush3.msra.mxu0 %v1712_v32 }
 0x36e   :  { %1432 = vmatprep.subr.mxu0 %v1647_v6 }
 0x426   :  { %v455_v41 = vpop.f32.mrf.mxu0 }
 0x427   :  { %v459_v42 = vadd.f32 %v1378_v12, %v455_v41 }
 0x428   :  { %v1409_v43 = vpop.f32.mrf.mxu0 }
 0x429   :  { %1563 = vtanh.f32 %v459_v42  ;;  %v1284_v45 = vmul.f32 -1.442695, %v459_v42 }
 0x42b   :  { %1565 = vpow2.f32 %v1284_v45 }
 0x436   :  { %v1564_v44 = vpop.eup %1563 }
 0x437   :  { %469 = vrot.lane.b32.xlu1 %v1564_v44, %s1650_s0 }
 0x438   :  { %v1566_v46 = vpop.eup %1565 }
 0x439   :  { %v463_v47 = vadd.f32 1.0, %v1566_v46 }
 0x43b   :  { %1567 = vrcp.f32 %v463_v47 }
 0x448   :  { %v1568_v48 = vpop.eup %1567 }
 0x449   :  { %v467_v51 = vmul.f32 %v1568_v48, %v377_v36 }
 0x4a9   :  { %v470_v49 = vpop.permute.xlu1 %469 }
 0x4aa   :  { %v472_v50 = vmul.f32 %v1568_v48, %v470_v49 }
 0x4ac   :  { %474 = vrot.lane.b32.xlu0 %v472_v50, %s1651_s3 }
 0x51e   :  { %v475_v52 = vpop.permute.xlu0 %474 }
 0x51f   :  { %v477_v53 = vadd.f32 %v475_v52, %v467_v51 }
 0x521   :  { %1569 = vtanh.f32 %v477_v53 }
 0x52e   :  { %v1570_v54 = vpop.eup %1569 }
 0x52f   :  { %480 = vrot.lane.b32.xlu1 %v1570_v54, %s1650_s0 }
 0x5a1   :  { %v481_v55 = vpop.permute.xlu1 %480 }
 0x5a2   :  { %v483_v56 = vmul.f32 %v1568_v48, %v481_v55 }
 0x5a4   :  { %485 = vrot.lane.b32.xlu0 %v483_v56, %s1651_s3 }
 0x616   :  { %v486_v57 = vpop.permute.xlu0 %485 }
 0x617   :  { %1419 = vmatmul.mubr.msk.f32.vlgmr.msra.gmra.mxu0 %vm285_vm12, %v486_v57 }
 0x618   :  { %1433 = vmatpush3.msra.mxu0 %v1699_v28  ;;  %1440 = vmatprep.mubr.msk.f32.mxu0 %vm1649_vm0, %v1647_v6 }
 0x619   :  { %1434 = vmatprep.subr.mxu0 %v1647_v6 }
 0x61a   :  { %1435 = vmatpush3.msra.mxu0 %v1704_v30 }
 0x61b   :  { %1436 = vmatprep.subr.mxu0 %v1647_v6 }
 0x61c   :  { %1437 = vmatpush3.msra.mxu0 %v1707_v31 }
 0x61d   :  { %1438 = vmatprep.subr.mxu0 %v1647_v6 }
 0x61e   :  { %1439 = vmatpush3.msra.mxu0 %v1712_v32 }
 0x61f   :  { %1454 = vmatprep.subr.mxu0 %v1647_v6 }
 0x6d7   :  { %v555_v58 = vpop.f32.mrf.mxu0 }
 0x6d8   :  { %v559_v59 = vadd.f32 %v555_v58, %v1802_v15 }
 0x6d9   :  { %v1420_v60 = vpop.f32.mrf.mxu0 }
 0x6da   :  { %1571 = vtanh.f32 %v559_v59  ;;  %v1286_v62 = vmul.f32 -1.442695, %v559_v59 }
 0x6dc   :  { %1573 = vpow2.f32 %v1286_v62 }
 0x6e7   :  { %v1572_v61 = vpop.eup %1571 }
 0x6e8   :  { %569 = vrot.lane.b32.xlu1 %v1572_v61, %s1650_s0 }
 0x6e9   :  { %v1574_v63 = vpop.eup %1573 }
 0x6ea   :  { %v563_v0 = vadd.f32 1.0, %v1574_v63 }
 0x6ec   :  { %1575 = vrcp.f32 %v563_v0 }
 0x6f9   :  { %v1576_v1 = vpop.eup %1575 }
 0x6fa   :  { %v567_v4 = vmul.f32 %v1576_v1, %v477_v53 }
 0x75a   :  { %v570_v2 = vpop.permute.xlu1 %569 }
 0x75b   :  { %v572_v3 = vmul.f32 %v1576_v1, %v570_v2 }
 0x75d   :  { %574 = vrot.lane.b32.xlu0 %v572_v3, %s1651_s3 }
 0x7cf   :  { %v575_v5 = vpop.permute.xlu0 %574 }
 0x7d0   :  { %v577_v7 = vadd.f32 %v575_v5, %v567_v4 }
 0x7d2   :  { %1577 = vtanh.f32 %v577_v7 }
 0x7df   :  { %v1578_v8 = vpop.eup %1577 }
 0x7e0   :  { %580 = vrot.lane.b32.xlu1 %v1578_v8, %s1650_s0 }
 0x852   :  { %v581_v9 = vpop.permute.xlu1 %580 }
 0x853   :  { %v583_v10 = vmul.f32 %v1576_v1, %v581_v9 }
 0x855   :  { %585 = vrot.lane.b32.xlu0 %v583_v10, %s1651_s3 }
 0x8c7   :  { %v586_v11 = vpop.permute.xlu0 %585 }
 0x8c8   :  { %1430 = vmatmul.mubr.msk.f32.vlgmr.msra.gmra.mxu1 %vm285_vm12, %v586_v11 }
 0x8c9   :  { %1444 = vmatpush3.msra.mxu1 %v1699_v28  ;;  %1451 = vmatprep.mubr.msk.f32.mxu1 %vm1649_vm0, %v1647_v6 }
 0x8ca   :  { %1445 = vmatprep.subr.mxu1 %v1647_v6 }
 0x8cb   :  { %1446 = vmatpush3.msra.mxu1 %v1704_v30 }
 0x8cc   :  { %1447 = vmatprep.subr.mxu1 %v1647_v6 }
 0x8cd   :  { %1448 = vmatpush3.msra.mxu1 %v1707_v31 }
 0x8ce   :  { %1449 = vmatprep.subr.mxu1 %v1647_v6 }
 0x8cf   :  { %1450 = vmatpush3.msra.mxu1 %v1712_v32 }
 0x8d0   :  { %1465 = vmatprep.subr.mxu1 %v1647_v6 }
 0x988   :  { %v655_v12 = vpop.f32.mrf.mxu1 }
 0x989   :  { %v659_v13 = vadd.f32 %v1800_v14, %v655_v12 }
 0x98a   :  { %v1431_v15 = vpop.f32.mrf.mxu1 }
 0x98b   :  { %1579 = vtanh.f32 %v659_v13  ;;  %v1288_v21 = vmul.f32 -1.442695, %v659_v13 }
 0x98d   :  { %1581 = vpow2.f32 %v1288_v21 }
 0x998   :  { %v1580_v20 = vpop.eup %1579 }
 0x999   :  { %669 = vrot.lane.b32.xlu1 %v1580_v20, %s1650_s0 }
 0x99a   :  { %v1582_v22 = vpop.eup %1581 }
 0x99b   :  { %v663_v23 = vadd.f32 1.0, %v1582_v22 }
 0x99d   :  { %1583 = vrcp.f32 %v663_v23 }
 0x9aa   :  { %v1584_v24 = vpop.eup %1583 }
 0x9ab   :  { %v667_v27 = vmul.f32 %v1584_v24, %v577_v7 }
 0xa0b   :  { %v670_v25 = vpop.permute.xlu1 %669 }
 0xa0c   :  { %v672_v26 = vmul.f32 %v1584_v24, %v670_v25 }
 0xa0e   :  { %674 = vrot.lane.b32.xlu0 %v672_v26, %s1651_s3 }
 0xa80   :  { %v675_v29 = vpop.permute.xlu0 %674 }
 0xa81   :  { %v677_v33 = vadd.f32 %v675_v29, %v667_v27 }
 0xa83   :  { %1585 = vtanh.f32 %v677_v33 }
 0xa90   :  { %v1586_v14 = vpop.eup %1585 }
 0xa91   :  { %680 = vrot.lane.b32.xlu1 %v1586_v14, %s1650_s0 }
 0xb03   :  { %v681_v34 = vpop.permute.xlu1 %680 }
 0xb04   :  { %v683_v35 = vmul.f32 %v1584_v24, %v681_v34 }
 0xb06   :  { %685 = vrot.lane.b32.xlu0 %v683_v35, %s1651_s3 }
 0xb78   :  { %v686_v36 = vpop.permute.xlu0 %685 }
 0xb79   :  { %1441 = vmatmul.mubr.msk.f32.vlgmr.msra.gmra.mxu0 %vm285_vm12, %v686_v36 }
 0xb7a   :  { %1455 = vmatpush3.msra.mxu0 %v1699_v28  ;;  %1462 = vmatprep.mubr.msk.f32.mxu0 %vm1649_vm0, %v1647_v6 }
 0xb7b   :  { %1456 = vmatprep.subr.mxu0 %v1647_v6 }
 0xb7c   :  { %1457 = vmatpush3.msra.mxu0 %v1704_v30 }
 0xb7d   :  { %1458 = vmatprep.subr.mxu0 %v1647_v6 }
 0xb7e   :  { %1459 = vmatpush3.msra.mxu0 %v1707_v31 }
 0xb7f   :  { %1460 = vmatprep.subr.mxu0 %v1647_v6 }
 0xb80   :  { %1461 = vmatpush3.msra.mxu0 %v1712_v32 }
 0xb81   :  { %1476 = vmatprep.subr.mxu0 %v1647_v6 }
 0xc39   :  { %v755_v37 = vpop.f32.mrf.mxu0 }
 0xc3a   :  { %v759_v38 = vadd.f32 %v755_v37, %v1806_v17 }
 0xc3b   :  { %v1442_v39 = vpop.f32.mrf.mxu0 }
 0xc3c   :  { %1587 = vtanh.f32 %v759_v38  ;;  %v1290_v41 = vmul.f32 -1.442695, %v759_v38  ;;  %v1086_v39 = vld [vmem:[#allocation2 + $0x40] sm:$0xff] }
 0xc3e   :  { %1589 = vpow2.f32 %v1290_v41  ;;  %v1084_v41 = vld [vmem:[#allocation2 + $0x30] sm:$0xff] }
 0xc49   :  { %v1588_v40 = vpop.eup %1587 }
 0xc4a   :  { %769 = vrot.lane.b32.xlu1 %v1588_v40, %s1650_s0  ;;  %v1085_v40 = vld [vmem:[#allocation2 + $0x38] sm:$0xff] }
 0xc4b   :  { %v1590_v42 = vpop.eup %1589 }
 0xc4c   :  { %v763_v43 = vadd.f32 1.0, %v1590_v42 }
 0xc4e   :  { %1591 = vrcp.f32 %v763_v43  ;;  %v1184_v43 = vld [vmem:[#allocation2 + $0xd0] sm:$0xff] }
 0xc5b   :  { %v1592_v44 = vpop.eup %1591 }
 0xc5c   :  { %v767_v47 = vmul.f32 %v1592_v44, %v677_v33 }
 0xcbc   :  { %v770_v45 = vpop.permute.xlu1 %769 }
 0xcbd   :  { %v772_v46 = vmul.f32 %v1592_v44, %v770_v45  ;;  %v1182_v45 = vld [vmem:[#allocation2 + $0xc0] sm:$0xff] }
 0xcbf   :  { %774 = vrot.lane.b32.xlu0 %v772_v46, %s1651_s3  ;;  %v1181_v46 = vld [vmem:[#allocation2 + $0xb8] sm:$0xff] }
 0xd31   :  { %v775_v48 = vpop.permute.xlu0 %774 }
 0xd32   :  { %v777_v49 = vadd.f32 %v775_v48, %v767_v47  ;;  %v1180_v47 = vld [vmem:[#allocation2 + $0xb0] sm:$0xff]  ;;  %v1179_v48 = vld [vmem:[#allocation2 + $0xa8] sm:$0xff] }
 0xd34   :  { %1593 = vtanh.f32 %v777_v49 }
 0xd41   :  { %v1594_v17 = vpop.eup %1593 }
 0xd42   :  { %780 = vrot.lane.b32.xlu1 %v1594_v17, %s1650_s0  ;;  %v1178_v17 = vld [vmem:[#allocation2 + $0xa0] sm:$0xff] }
 0xdb4   :  { %v781_v50 = vpop.permute.xlu1 %780 }
 0xdb5   :  { %v783_v51 = vmul.f32 %v1592_v44, %v781_v50  ;;  %v1183_v44 = vld [vmem:[#allocation2 + $0xc8] sm:$0xff] }
 0xdb7   :  { %785 = vrot.lane.b32.xlu0 %v783_v51, %s1651_s3 }
 0xe29   :  { %v786_v52 = vpop.permute.xlu0 %785 }
 0xe2a   :  { %1452 = vmatmul.mubr.msk.f32.vlgmr.msra.gmra.mxu1 %vm285_vm12, %v786_v52  ;;  %v1177_v52 = vld [vmem:[#allocation2 + $0x98] sm:$0xff] }
 0xe2b   :  { %1466 = vmatpush3.msra.mxu1 %v1699_v28  ;;  %1473 = vmatprep.mubr.msk.f32.mxu1 %vm1649_vm0, %v1647_v6 }
 0xe2c   :  { %1467 = vmatprep.subr.mxu1 %v1647_v6 }
 0xe2d   :  { %1468 = vmatpush3.msra.mxu1 %v1704_v30 }
 0xe2e   :  { %1469 = vmatprep.subr.mxu1 %v1647_v6 }
 0xe2f   :  { %1470 = vmatpush3.msra.mxu1 %v1707_v31 }
 0xe30   :  { %1471 = vmatprep.subr.mxu1 %v1647_v6 }
 0xe31   :  { %1472 = vmatpush3.msra.mxu1 %v1712_v32 }
 0xe32   :  { %1487 = vmatprep.subr.mxu1 %v1647_v6 }
 0xeea   :  { %v855_v53 = vpop.f32.mrf.mxu1 }
 0xeeb   :  { %v859_v28 = vadd.f32 %v1804_v16, %v855_v53  ;;  %v1176_v53 = vld [vmem:[#allocation2 + $0x90] sm:$0xff] }
 0xeec   :  { %v1453_v54 = vpop.f32.mrf.mxu1 }
 0xeed   :  { %1595 = vtanh.f32 %v859_v28  ;;  %v1292_v56 = vmul.f32 -1.442695, %v859_v28  ;;  %v1175_v28 = vld [vmem:[#allocation2 + $0x88] sm:$0xff]  ;;  %v1174_v54 = vld [vmem:[#allocation2 + $0x80] sm:$0xff] }
 0xeef   :  { %1597 = vpow2.f32 %v1292_v56  ;;  %v1172_v56 = vld [vmem:[#allocation2 + $0x70] sm:$0xff] }
 0xefa   :  { %v1596_v55 = vpop.eup %1595 }
 0xefb   :  { %869 = vrot.lane.b32.xlu1 %v1596_v55, %s1650_s0  ;;  %v1173_v55 = vld [vmem:[#allocation2 + $0x78] sm:$0xff] }
 0xefc   :  { %v1598_v30 = vpop.eup %1597 }
 0xefd   :  { %v863_v57 = vadd.f32 1.0, %v1598_v30  ;;  %v1171_v30 = vld [vmem:[#allocation2 + $0x68] sm:$0xff] }
 0xeff   :  { %1599 = vrcp.f32 %v863_v57  ;;  %v1170_v57 = vld [vmem:[#allocation2 + $0x60] sm:$0xff] }
 0xf0c   :  { %v1600_v31 = vpop.eup %1599 }
 0xf0d   :  { %v867_v32 = vmul.f32 %v1600_v31, %v777_v49 }
 0xf6d   :  { %v870_v58 = vpop.permute.xlu1 %869 }
 0xf6e   :  { %v872_v59 = vmul.f32 %v1600_v31, %v870_v58  ;;  %v1297_v58 = vld [vmem:[#allocation2 + $0x50] ss:$0 sm:$0xff] }
 0xf70   :  { %874 = vrot.lane.b32.xlu0 %v872_v59, %s1651_s3 }
 0xfe2   :  { %v875_v60 = vpop.permute.xlu0 %874 }
 0xfe3   :  { %v877_v61 = vadd.f32 %v875_v60, %v867_v32 }
 0xfe5   :  { %1601 = vtanh.f32 %v877_v61 }
 0xff2   :  { %v1602_v16 = vpop.eup %1601 }
 0xff3   :  { %880 = vrot.lane.b32.xlu1 %v1602_v16, %s1650_s0  ;;  %v1299_v16 = vld [vmem:[#allocation2 + $0xd8] ss:$0 sm:$0xff] }
0x1065   :  { %v881_v62 = vpop.permute.xlu1 %880 }
0x1066   :  { %v883_v63 = vmul.f32 %v1600_v31, %v881_v62  ;;  %v1169_v31 = vld [vmem:[#allocation2 + $0x58] sm:$0xff] }
0x1068   :  { %885 = vrot.lane.b32.xlu0 %v883_v63, %s1651_s3 }
0x10da   :  { %v886_v0 = vpop.permute.xlu0 %885 }
0x10db   :  { %1463 = vmatmul.mubr.msk.f32.vlgmr.msra.gmra.mxu0 %vm285_vm12, %v886_v0 }
0x10dc   :  { %1484 = vmatprep.mubr.msk.f32.mxu0 %vm1649_vm0, %v1647_v6 }
0x119b   :  { %v955_v1 = vpop.f32.mrf.mxu0 }
0x119c   :  { %v959_v2 = vadd.f32 %v955_v1, %v1810_v19 }
0x119d   :  { %v1464_v3 = vpop.f32.mrf.mxu0 }
0x119e   :  { %1603 = vtanh.f32 %v959_v2  ;;  %v1294_v5 = vmul.f32 -1.442695, %v959_v2 }
0x11a0   :  { %1605 = vpow2.f32 %v1294_v5 }
0x11ab   :  { %v1604_v4 = vpop.eup %1603 }
0x11ac   :  { %969 = vrot.lane.b32.xlu1 %v1604_v4, %s1650_s0 }
0x11ad   :  { %v1606_v7 = vpop.eup %1605 }
0x11ae   :  { %v963_v8 = vadd.f32 1.0, %v1606_v7 }
0x11b0   :  { %1607 = vrcp.f32 %v963_v8 }
0x11bd   :  { %v1608_v9 = vpop.eup %1607 }
0x11be   :  { %v967_v12 = vmul.f32 %v1608_v9, %v877_v61 }
0x121e   :  { %v970_v10 = vpop.permute.xlu1 %969 }
0x121f   :  { %v972_v11 = vmul.f32 %v1608_v9, %v970_v10 }
0x1221   :  { %974 = vrot.lane.b32.xlu0 %v972_v11, %s1651_s3 }
0x1293   :  { %v975_v13 = vpop.permute.xlu0 %974 }
0x1294   :  { %v977_v15 = vadd.f32 %v975_v13, %v967_v12 }
0x1296   :  { %1609 = vtanh.f32 %v977_v15 }
0x12a3   :  { %v1610_v19 = vpop.eup %1609 }
0x12a4   :  { %980 = vrot.lane.b32.xlu1 %v1610_v19, %s1650_s0 }
0x1316   :  { %v981_v20 = vpop.permute.xlu1 %980 }
0x1317   :  { %v983_v21 = vmul.f32 %v1608_v9, %v981_v20 }
0x1319   :  { %985 = vrot.lane.b32.xlu0 %v983_v21, %s1651_s3 }
0x138b   :  { %v986_v22 = vpop.permute.xlu0 %985 }
0x138c   :  { %1474 = vmatmul.mubr.msk.f32.vlgmr.msra.gmra.mxu1 %vm285_vm12, %v986_v22 }
0x138d   :  { %1519 = vmatprep.mubr.msk.f32.mxu1 %vm1649_vm0, %v1647_v6  ;;  %1488 = vmatpush3.msra.mxu1 %v1184_v43 }
0x138e   :  { %1489 = vmatprep.subr.mxu1 %v1647_v6 }
0x138f   :  { %1490 = vmatpush3.msra.mxu1 %v1183_v44 }
0x1390   :  { %1491 = vmatprep.subr.mxu1 %v1647_v6 }
0x1391   :  { %1492 = vmatpush3.msra.mxu1 %v1182_v45 }
0x1392   :  { %1493 = vmatprep.subr.mxu1 %v1647_v6 }
0x1393   :  { %1494 = vmatpush3.msra.mxu1 %v1181_v46 }
0x1394   :  { %1495 = vmatprep.subr.mxu1 %v1647_v6 }
0x1395   :  { %1496 = vmatpush3.msra.mxu1 %v1180_v47 }
0x1396   :  { %1497 = vmatprep.subr.mxu1 %v1647_v6 }
0x1397   :  { %1498 = vmatpush3.msra.mxu1 %v1179_v48 }
0x1398   :  { %1499 = vmatprep.subr.mxu1 %v1647_v6 }
0x1399   :  { %1500 = vmatpush3.msra.mxu1 %v1178_v17 }
0x139a   :  { %1501 = vmatprep.subr.mxu1 %v1647_v6 }
0x139b   :  { %1502 = vmatpush3.msra.mxu1 %v1177_v52 }
0x139c   :  { %1503 = vmatprep.subr.mxu1 %v1647_v6 }
0x139d   :  { %1504 = vmatpush3.msra.mxu1 %v1176_v53 }
0x139e   :  { %1505 = vmatprep.subr.mxu1 %v1647_v6 }
0x139f   :  { %1506 = vmatpush3.msra.mxu1 %v1175_v28 }
0x13a0   :  { %1507 = vmatprep.subr.mxu1 %v1647_v6 }
0x13a1   :  { %1508 = vmatpush3.msra.mxu1 %v1174_v54 }
0x13a2   :  { %1509 = vmatprep.subr.mxu1 %v1647_v6 }
0x13a3   :  { %1510 = vmatpush3.msra.mxu1 %v1173_v55 }
0x13a4   :  { %1511 = vmatprep.subr.mxu1 %v1647_v6 }
0x13a5   :  { %1512 = vmatpush3.msra.mxu1 %v1172_v56 }
0x13a6   :  { %1513 = vmatprep.subr.mxu1 %v1647_v6 }
0x13a7   :  { %1514 = vmatpush3.msra.mxu1 %v1171_v30 }
0x13a8   :  { %1515 = vmatprep.subr.mxu1 %v1647_v6 }
0x13a9   :  { %1516 = vmatpush3.msra.mxu1 %v1170_v57 }
0x13aa   :  { %1517 = vmatprep.subr.mxu1 %v1647_v6 }
0x13ab   :  { %1518 = vmatpush3.msra.mxu1 %v1169_v31 }
0x144c   :  { %v1055_v23 = vpop.f32.mrf.mxu1 }
0x144d   :  { %v1059_v24 = vadd.f32 %v1808_v18, %v1055_v23  ;;  %v1087_v18 = vld [vmem:[#allocation2 + $0x48] sm:$0xff] }
0x144e   :  { %v1475_v25 = vpop.f32.mrf.mxu1  ;;  %1477 = vmatpush3.msra.mxu0 %v1087_v18 }
0x144f   :  { %1611 = vtanh.f32 %v1059_v24  ;;  %v1296_v27 = vmul.f32 -1.442695, %v1059_v24  ;;  %1478 = vmatprep.subr.mxu0 %v1647_v6 }
0x1450   :  { %1479 = vmatpush3.msra.mxu0 %v1086_v39 }
0x1451   :  { %1613 = vpow2.f32 %v1296_v27  ;;  %1480 = vmatprep.subr.mxu0 %v1647_v6 }
0x1452   :  { %1481 = vmatpush3.msra.mxu0 %v1085_v40 }
0x1453   :  { %1482 = vmatprep.subr.mxu0 %v1647_v6 }
0x1454   :  { %1483 = vmatpush3.msra.mxu0 %v1084_v41 }
0x145c   :  { %v1612_v26 = vpop.eup %1611 }
0x145d   :  { %1069 = vrot.lane.b32.xlu1 %v1612_v26, %s1650_s0 }
0x145e   :  { %v1614_v29 = vpop.eup %1613 }
0x145f   :  { %v1063_v33 = vadd.f32 1.0, %v1614_v29 }
0x1461   :  { %1615 = vrcp.f32 %v1063_v33 }
0x146e   :  { %v1616_v14 = vpop.eup %1615 }
0x146f   :  { %v1067_v36 = vmul.f32 %v1616_v14, %v977_v15 }
0x14cf   :  { %v1070_v34 = vpop.permute.xlu1 %1069 }
0x14d0   :  { %v1072_v35 = vmul.f32 %v1616_v14, %v1070_v34 }
0x14d2   :  { %1074 = vrot.lane.b32.xlu0 %v1072_v35, %s1651_s3 }
0x1544   :  { %v1075_v37 = vpop.permute.xlu0 %1074 }
0x1545   :  { %v1077_v38 = vadd.f32 %v1075_v37, %v1067_v36 }
0x1547   :  { %1617 = vtanh.f32 %v1077_v38 }
0x1554   :  { %v1618_v42 = vpop.eup %1617 }
0x1555   :  { %1080 = vrot.lane.b32.xlu1 %v1618_v42, %s1650_s0 }
0x15c7   :  { %v1081_v49 = vpop.permute.xlu1 %1080 }
0x15c8   :  { %v1083_v50 = vmul.f32 %v1616_v14, %v1081_v49 }
0x15ca   :  { %1094 = vrot.lane.b32.xlu0 %v1083_v50, %s1651_s3 }
0x163c   :  { %v1095_v51 = vpop.permute.xlu0 %1094 }
0x163d   :  { %1485 = vmatmul.mubr.msk.f32.vlgmr.msra.gmra.mxu0 %vm285_vm12, %v1095_v51 }
0x16fd   :  { %v1164_v59 = vpop.f32.mrf.mxu0 }
0x16fe   :  { %v1165_v32 = vadd.f32 %v1297_v58, %v1164_v59 }
0x16ff   :  { %v1486_v60 = vpop.f32.mrf.mxu0 }
0x1700   :  { %1619 = vtanh.f32 %v1165_v32 }
0x170d   :  { %v1620_v61 = vpop.eup %1619 }
0x170e   :  { %1520 = vmatmul.mubr.f32.vlgmr.msra.gmra.mxu1 %v1620_v61 }
0x17ce   :  { %v1256_v62 = vpop.f32.mrf.mxu1 }
0x17cf   :  { %v1257_v63 = vadd.f32 %v1299_v16, %v1256_v62 }
0x17d0   :  { %v1521_v0 = vpop.f32.mrf.mxu1 }
0x17d1   :  { %1260 = vst [vmem:[%s1935_s2] sm:$0xff] %v1257_v63 }
0x17d2   :  { %1265 = vsyncpa [#allocation3], 1 }

</bundles_post_ra>
